<compile_context>
chip_gen: v6e
topology: v6e:2x2x1
jax: 0.10.0
libtpu: 0.0.40
codegen_flags: <defaults>
</compile_context>

<pallas_src>
import functools

import jax
import jax.numpy as jnp
from jax.experimental import pallas as pl
from jax.experimental.pallas import tpu as pltpu

NUM_CLASSES = 2
IN_FEATURES = 1024                     # FastRCNNPredictor in_features for maskrcnn_resnet50_fpn_v2
N_OUT = NUM_CLASSES + 4 * NUM_CLASSES  # 2 cls logits + 8 box deltas = 10
OUT_W = 16                             # minimal padded lane width for the fused head output


def _predictor_kernel(feat_ref, w_ref, b_ref, out_ref):
    """Fused cls_score + bbox_pred: one MXU matmul over full K, f32 accumulate + bias."""
    out_ref[...] = (
        jnp.dot(feat_ref[...], w_ref[...], preferred_element_type=jnp.float32)
        + b_ref[...]
    ).astype(out_ref.dtype)


def pack_predictor_params(w_cls, b_cls, w_bbox, b_bbox):
    """Fuse both heads into a single (K, OUT_W) bf16 weight slab and (1, OUT_W) f32 bias.

    Called once at init time (not per forward) so no per-call slab materialization."""
    K = w_cls.shape[0]
    w = (
        jnp.zeros((K, OUT_W), jnp.float32)
        .at[:, :N_OUT]
        .set(jnp.concatenate([w_cls, w_bbox], axis=1))
        .astype(jnp.bfloat16)
    )
    b = (
        jnp.zeros((1, OUT_W), jnp.float32)
        .at[:, :N_OUT]
        .set(jnp.concatenate([b_cls.reshape(1, -1), b_bbox.reshape(1, -1)], axis=1))
    )
    return w, b


@functools.partial(jax.jit, static_argnames=("tm",))
def fastrcnn_predictor(box_features, w_packed, b_packed, *, tm=512):
    """box_features: (N, IN_FEATURES). w_packed: (IN_FEATURES, OUT_W) bf16,
    b_packed: (1, OUT_W) f32 (from pack_predictor_params).
    Returns (N, NUM_CLASSES) class logits and (N, 4*NUM_CLASSES) box deltas, f32."""
    N, K = box_features.shape

    # Halve the dominant feature DMA; MXU-native bf16 with f32 accumulation.
    feat = box_features if box_features.dtype == jnp.bfloat16 else box_features.astype(jnp.bfloat16)

    # Single block for small RoI counts; otherwise tile the RoI axis only (full K per
    # block, no K grid axis). No padding copy: Pallas masks the ragged last block.
    blk_m = N if N <= tm else tm
    grid = (pl.cdiv(N, blk_m),)

    cost = pl.CostEstimate(
        flops=2 * N * K * OUT_W,
        transcendentals=0,
        bytes_accessed=(feat.size * feat.dtype.itemsize
                        + w_packed.size * w_packed.dtype.itemsize
                        + b_packed.size * 4
                        + N * OUT_W * 4),
    )

    out = pl.pallas_call(
        _predictor_kernel,
        out_shape=jax.ShapeDtypeStruct((N, OUT_W), jnp.float32),
        grid_spec=pltpu.PrefetchScalarGridSpec(
            num_scalar_prefetch=0,
            grid=grid,
            in_specs=[
                # RoI features: double-buffered (default), tiled along the RoI axis.
                pl.BlockSpec((blk_m, K), lambda i: (i, 0)),
                # Fused weight slab: constant block -> fetched once, single-buffered.
                pl.BlockSpec((K, OUT_W), lambda i: (0, 0),
                             pipeline_mode=pl.Buffered(1)),
                # Fused bias: constant block, single-buffered.
                pl.BlockSpec((1, OUT_W), lambda i: (0, 0),
                             pipeline_mode=pl.Buffered(1)),
            ],
            out_specs=pl.BlockSpec((blk_m, OUT_W), lambda i: (i, 0)),
        ),
        compiler_params=pltpu.CompilerParams(
            dimension_semantics=("parallel",),
            vmem_limit_bytes=32 * 1024 * 1024,
        ),
        cost_estimate=cost,
    )(feat, w_packed, b_packed)

    cls_logits = out[:, :NUM_CLASSES]
    box_deltas = out[:, NUM_CLASSES:N_OUT]
    return cls_logits, box_deltas


def init_predictor_params(key):
    """Deterministic synthetic init of FastRCNNPredictor params (PyTorch Linear shapes)."""
    k1, k2, k3, k4 = jax.random.split(key, 4)
    scale = 1.0 / jnp.sqrt(jnp.float32(IN_FEATURES))
    # PyTorch Linear weight layout is (out, in); transpose to (in, out) for the kernel.
    w_cls_t = jax.random.uniform(k1, (NUM_CLASSES, IN_FEATURES), jnp.float32,
                                 -scale, scale).T
    b_cls = jax.random.uniform(k2, (1, NUM_CLASSES), jnp.float32, -scale, scale)
    w_bbox_t = jax.random.uniform(k3, (4 * NUM_CLASSES, IN_FEATURES), jnp.float32,
                                  -scale, scale).T
    b_bbox = jax.random.uniform(k4, (1, 4 * NUM_CLASSES), jnp.float32, -scale, scale)
    return w_cls_t, b_cls, w_bbox_t, b_bbox


if __name__ == "__main__":
    key = jax.random.PRNGKey(0)
    k_img, k_feat, k_par, k_big = jax.random.split(key, 4)

    # Module-level input (what alchemy.forward receives): a small batch of images.
    # TODO(synk): images are not consumed — backbone/RPN/RoIAlign/NMS/mask head untranslated.
    images = jax.random.normal(k_img, (2, 3, 64, 64), jnp.float32)   # NCHW

    # Box-head features feeding the (re-initialized) FastRCNNPredictor.
    num_rois = 16
    box_features = jax.random.normal(k_feat, (num_rois, IN_FEATURES), jnp.float32)

    w_cls, b_cls, w_bbox, b_bbox = init_predictor_params(k_par)
    w_packed, b_packed = pack_predictor_params(w_cls, b_cls, w_bbox, b_bbox)

    cls_logits, box_deltas = fastrcnn_predictor(box_features, w_packed, b_packed)
    jax.block_until_ready((cls_logits, box_deltas))

    # Pure-JAX reference (same bf16-rounded operands, f32 accumulate) — bf16 tolerance.
    w_ref = w_packed.astype(jnp.float32)
    feat_ref = box_features.astype(jnp.bfloat16).astype(jnp.float32)
    ref = feat_ref @ w_ref + b_packed
    assert cls_logits.shape == (num_rois, NUM_CLASSES)
    assert box_deltas.shape == (num_rois, 4 * NUM_CLASSES)
    assert jnp.allclose(cls_logits, ref[:, :NUM_CLASSES], atol=2e-2, rtol=2e-2)
    assert jnp.allclose(box_deltas, ref[:, NUM_CLASSES:N_OUT], atol=2e-2, rtol=2e-2)

    # Also exercise the tiled large-N path (ragged RoI count like real proposals):
    # 1000 RoIs -> 2 grid steps of 512 (ragged last block, no pad copy).
    big_n = 1000
    big_feat = jax.random.normal(k_big, (big_n, IN_FEATURES), jnp.float32)
    big_cls, big_box = fastrcnn_predictor(big_feat, w_packed, b_packed)
    jax.block_until_ready((big_cls, big_box))
    big_ref = big_feat.astype(jnp.bfloat16).astype(jnp.float32) @ w_ref + b_packed
    assert big_cls.shape == (big_n, NUM_CLASSES)
    assert big_box.shape == (big_n, 4 * NUM_CLASSES)
    assert jnp.allclose(big_cls, big_ref[:, :NUM_CLASSES], atol=2e-2, rtol=2e-2)
    assert jnp.allclose(big_box, big_ref[:, NUM_CLASSES:N_OUT], atol=2e-2, rtol=2e-2)

    print("KERNEL_OK")
</pallas_src>

<mosaic_0001>
module attributes {stable_mosaic.version = 11 : i64} {
  func.func @_predictor_kernel(%arg0: i32, %arg1: memref<16x1024xbf16, #tpu.memory_space<vmem>>, %arg2: memref<1024x16xbf16, #tpu.memory_space<vmem>>, %arg3: memref<1x16xf32, #tpu.memory_space<vmem>>, %arg4: memref<16x16xf32, #tpu.memory_space<vmem>>) attributes {dimension_semantics = [#tpu.dimension_semantics<parallel>], iteration_bounds = array<i64: 1>, scalar_prefetch = 0 : i64, scratch_operands = 0 : i64, tpu.core_type = #tpu.core_type<tc>, window_params = [{transform_indices = @transform_0, window_bounds = array<i64: 16, 1024>}, {pipeline_mode = #tpu.pipeline_mode<synchronous>, transform_indices = @transform_1, window_bounds = array<i64: 1024, 16>}, {pipeline_mode = #tpu.pipeline_mode<synchronous>, transform_indices = @transform_2, window_bounds = array<i64: 1, 16>}, {transform_indices = @transform_3, window_bounds = array<i64: 16, 16>}]} {
    %c0 = arith.constant 0 : index
    %c0_0 = arith.constant 0 : index
    %0 = vector.load %arg1[%c0, %c0_0] : memref<16x1024xbf16, #tpu.memory_space<vmem>>, vector<16x1024xbf16>
    %c0_1 = arith.constant 0 : index
    %c0_2 = arith.constant 0 : index
    %1 = vector.load %arg2[%c0_1, %c0_2] : memref<1024x16xbf16, #tpu.memory_space<vmem>>, vector<1024x16xbf16>
    %cst = arith.constant dense<0.000000e+00> : vector<16x16xf32>
    %2 = tpu.matmul %0, %1, %cst {dimension_numbers = #tpu.dot_dimension_numbers<[1], [0], [0], [1], [0, 0, 1, 1], [], []>} : vector<16x1024xbf16>, vector<1024x16xbf16>, vector<16x16xf32> -> vector<16x16xf32>
    %c0_3 = arith.constant 0 : index
    %c0_4 = arith.constant 0 : index
    %3 = vector.load %arg3[%c0_3, %c0_4] : memref<1x16xf32, #tpu.memory_space<vmem>>, vector<1x16xf32>
    %4 = vector.broadcast %3 : vector<1x16xf32> to vector<16x16xf32>
    %5 = arith.addf %2, %4 : vector<16x16xf32>
    %c0_5 = arith.constant 0 : index
    %c0_6 = arith.constant 0 : index
    %6 = vector.load %arg4[%c0_5, %c0_6] : memref<16x16xf32, #tpu.memory_space<vmem>>, vector<16x16xf32>
    tpu.vector_store %arg4[%c0_5, %c0_6], %5 {strides = array<i32>} : memref<16x16xf32, #tpu.memory_space<vmem>>, vector<16x16xf32>,
    return
  }
  func.func @transform_0(%arg0: i32) -> (i32, i32) {
    %c0_i32 = arith.constant 0 : i32
    %c0_i32_0 = arith.constant 0 : i32
    return %arg0, %c0_i32 : i32, i32
  }
  func.func @transform_1(%arg0: i32) -> (i32, i32) {
    %c0_i32 = arith.constant 0 : i32
    %c0_i32_0 = arith.constant 0 : i32
    %c0_i32_1 = arith.constant 0 : i32
    return %c0_i32, %c0_i32_0 : i32, i32
  }
  func.func @transform_2(%arg0: i32) -> (i32, i32) {
    %c0_i32 = arith.constant 0 : i32
    %c0_i32_0 = arith.constant 0 : i32
    %c0_i32_1 = arith.constant 0 : i32
    return %c0_i32, %c0_i32_0 : i32, i32
  }
  func.func @transform_3(%arg0: i32) -> (i32, i32) {
    %c0_i32 = arith.constant 0 : i32
    %c0_i32_0 = arith.constant 0 : i32
    return %arg0, %c0_i32 : i32, i32
  }
}

</mosaic_0001>

<bundles_post_ra>
// kernel: fastrcnn_predictor.1
= control target key start
LH: loop header
LB: loop body
LE: loop exit
PB: predicated region body
PF: predicated region fallthrough
CT: control target
= control target key end

     0   :  { %vm746_vm0 = vcmask 130048   ;;  %s1223_s1 = inlined_call_operand.vmem [shape: bf16[1024,16], index: 1, kind: input, shape index: {}]   ;;  %s1224_s0 = inlined_call_operand.vmem [shape: bf16[16,1024], index: 0, kind: input, shape index: {}]   ;;  %s1225_s2 = inlined_call_operand.vmem [shape: f32[1,16], index: 2, kind: input, shape index: {}]   ;;  %s1226_s3 = inlined_call_operand.vmem [shape: f32[16,16], index: 3, kind: output, shape index: {}]  }
   0x1   :  { %v914_v0 = vld [vmem:[%s1223_s1 + $0x78] sm:$0xff]   ;;  %v918_v4 = vld [vmem:[%s1223_s1 + $0x70] sm:$0xff]   ;;  %v922_v8 = vld [vmem:[%s1223_s1 + $0x68] sm:$0xff]  }
   0x2   :  { %v915_v1 = vld [vmem:[%s1223_s1 + $0xf8] sm:$0xff]   ;;  %826 = vmatprep.subr.bf16.mxu0 %v914_v0  ;;  %v919_v5 = vld [vmem:[%s1223_s1 + $0xf0] sm:$0xff]   ;;  %v923_v9 = vld [vmem:[%s1223_s1 + $0xe8] sm:$0xff]  }
   0x3   :  { %v916_v2 = vld [vmem:[%s1223_s1 + $0x38] sm:$0xff]   ;;  %848 = vmatprep.subr.bf16.mxu1 %v915_v1  ;;  %v920_v6 = vld [vmem:[%s1223_s1 + $0x30] sm:$0xff]   ;;  %v924_v10 = vld [vmem:[%s1223_s1 + $0x28] sm:$0xff]  }
   0x4   :  { %v917_v3 = vld [vmem:[%s1223_s1 + $0xb8] sm:$0xff]   ;;  %827 = vmatpush3.bf16.msra.mxu0 %v916_v2  ;;  %v921_v7 = vld [vmem:[%s1223_s1 + $0xb0] sm:$0xff]   ;;  %v925_v11 = vld [vmem:[%s1223_s1 + $0xa8] sm:$0xff]  }
   0x5   :  { %849 = vmatpush3.bf16.msra.mxu1 %v917_v3  ;;  %828 = vmatprep.subr.bf16.mxu0 %v918_v4  ;;  %v926_v12 = vld [vmem:[%s1223_s1 + $0x60] sm:$0xff]   ;;  %v930_v16 = vld [vmem:[%s1223_s1 + $0x58] sm:$0xff]   ;;  %v934_v20 = vld [vmem:[%s1223_s1 + $0x50] sm:$0xff]  }
   0x6   :  { %850 = vmatprep.subr.bf16.mxu1 %v919_v5  ;;  %v927_v13 = vld [vmem:[%s1223_s1 + $0xe0] sm:$0xff]   ;;  %v931_v17 = vld [vmem:[%s1223_s1 + $0xd8] sm:$0xff]   ;;  %v935_v21 = vld [vmem:[%s1223_s1 + $0xd0] sm:$0xff]  }
   0x7   :  { %v928_v14 = vld [vmem:[%s1223_s1 + $0x20] sm:$0xff]   ;;  %v932_v18 = vld [vmem:[%s1223_s1 + $0x18] sm:$0xff]   ;;  %v936_v22 = vld [vmem:[%s1223_s1 + $0x10] sm:$0xff]  }
   0x8   :  { %829 = vmatpush3.bf16.msra.mxu0 %v920_v6  ;;  %v929_v15 = vld [vmem:[%s1223_s1 + $0xa0] sm:$0xff]   ;;  %v933_v19 = vld [vmem:[%s1223_s1 + $0x98] sm:$0xff]   ;;  %v937_v23 = vld [vmem:[%s1223_s1 + $0x90] sm:$0xff]  }
   0x9   :  { %851 = vmatpush3.bf16.msra.mxu1 %v921_v7  ;;  %830 = vmatprep.subr.bf16.mxu0 %v922_v8  ;;  %v938_v24 = vld [vmem:[%s1223_s1 + $0x48] sm:$0xff]   ;;  %v942_v28 = vld [vmem:[%s1223_s1 + $0x40] sm:$0xff]   ;;  %v946_v40 = vld [vmem:[%s1223_s1 + $0x178] sm:$0xff]  }
   0xa   :  { %852 = vmatprep.subr.bf16.mxu1 %v923_v9  ;;  %v939_v25 = vld [vmem:[%s1223_s1 + $0xc8] sm:$0xff]   ;;  %v943_v29 = vld [vmem:[%s1223_s1 + $0xc0] sm:$0xff]   ;;  %v947_v41 = vld [vmem:[%s1223_s1 + $0x1f8] sm:$0xff]  }
   0xb   :  { %v940_v26 = vld [vmem:[%s1223_s1 + $0x8] sm:$0xff]   ;;  %v944_v30 = vld [vmem:[%s1223_s1] sm:$0xff]   ;;  %v948_v42 = vld [vmem:[%s1223_s1 + $0x138] sm:$0xff]  }
   0xc   :  { %831 = vmatpush3.bf16.msra.mxu0 %v924_v10  ;;  %v941_v27 = vld [vmem:[%s1223_s1 + $0x88] sm:$0xff]   ;;  %v945_v31 = vld [vmem:[%s1223_s1 + $0x80] sm:$0xff]   ;;  %v949_v43 = vld [vmem:[%s1223_s1 + $0x1b8] sm:$0xff]  }
   0xd   :  { %853 = vmatpush3.bf16.msra.mxu1 %v925_v11  ;;  %832 = vmatprep.subr.bf16.mxu0 %v926_v12  ;;  %v15_v32 = vld [vmem:[%s1224_s0] sm:$0xff]  ;;  %v16_v34 = vld [vmem:[%s1224_s0 + $0x8] sm:$0xff]  ;;  %v950_v44 = vld [vmem:[%s1223_s1 + $0x170] sm:$0xff]  }
   0xe   :  { %854 = vmatprep.subr.bf16.mxu1 %v927_v13  ;;  %v19_v33 = vld [vmem:[%s1224_s0 + $0x20] sm:$0xff]  ;;  %v20_v37 = vld [vmem:[%s1224_s0 + $0x28] sm:$0xff]  ;;  %v951_v45 = vld [vmem:[%s1223_s1 + $0x1f0] sm:$0xff]  }
   0xf   :  { %v754_v35 = vcombine.low %v15_v32, %v19_v33  ;;  %v755_v36 = vcombine.high %v15_v32, %v19_v33  ;;  %v756_v38 = vcombine.low %v16_v34, %v20_v37  ;;  %v757_v39 = vcombine.high %v16_v34, %v20_v37  ;;  %v952_v46 = vld [vmem:[%s1223_s1 + $0x130] sm:$0xff]   ;;  %v954_v48 = vld [vmem:[%s1223_s1 + $0x168] sm:$0xff]   ;;  %v958_v52 = vld [vmem:[%s1223_s1 + $0x160] sm:$0xff]  }
  0x10   :  { %833 = vmatpush3.bf16.msra.mxu0 %v928_v14  ;;  %v953_v47 = vld [vmem:[%s1223_s1 + $0x1b0] sm:$0xff]   ;;  %v955_v49 = vld [vmem:[%s1223_s1 + $0x1e8] sm:$0xff]   ;;  %v959_v53 = vld [vmem:[%s1223_s1 + $0x1e0] sm:$0xff]  }
  0x11   :  { %855 = vmatpush3.bf16.msra.mxu1 %v929_v15  ;;  %834 = vmatprep.subr.bf16.mxu0 %v930_v16  ;;  %v956_v50 = vld [vmem:[%s1223_s1 + $0x128] sm:$0xff]   ;;  %v960_v54 = vld [vmem:[%s1223_s1 + $0x120] sm:$0xff]   ;;  %v962_v56 = vld [vmem:[%s1223_s1 + $0x158] sm:$0xff]  }
  0x12   :  { %856 = vmatprep.subr.bf16.mxu1 %v931_v17  ;;  %614 = vmatprep.mubr.bf16.mxu0 %v755_v36  ;;  %v957_v51 = vld [vmem:[%s1223_s1 + $0x1a8] sm:$0xff]   ;;  %v961_v55 = vld [vmem:[%s1223_s1 + $0x1a0] sm:$0xff]   ;;  %v963_v57 = vld [vmem:[%s1223_s1 + $0x1d8] sm:$0xff]  }
  0x13   :  { %655 = vmatprep.mubr.bf16.mxu1 %v757_v39  ;;  %v964_v58 = vld [vmem:[%s1223_s1 + $0x118] sm:$0xff]   ;;  %v966_v60 = vld [vmem:[%s1223_s1 + $0x150] sm:$0xff]   ;;  %v970_v0 = vld [vmem:[%s1223_s1 + $0x148] sm:$0xff]  }
  0x14   :  { %835 = vmatpush3.bf16.msra.mxu0 %v932_v18  ;;  %v965_v59 = vld [vmem:[%s1223_s1 + $0x198] sm:$0xff]   ;;  %v967_v61 = vld [vmem:[%s1223_s1 + $0x1d0] sm:$0xff]   ;;  %v971_v1 = vld [vmem:[%s1223_s1 + $0x1c8] sm:$0xff]  }
  0x15   :  { %857 = vmatpush3.bf16.msra.mxu1 %v933_v19  ;;  %836 = vmatprep.subr.bf16.mxu0 %v934_v20  ;;  %v968_v62 = vld [vmem:[%s1223_s1 + $0x110] sm:$0xff]   ;;  %v972_v2 = vld [vmem:[%s1223_s1 + $0x108] sm:$0xff]   ;;  %v974_v4 = vld [vmem:[%s1223_s1 + $0x140] sm:$0xff]  }
  0x16   :  { %858 = vmatprep.subr.bf16.mxu1 %v935_v21  ;;  %v969_v63 = vld [vmem:[%s1223_s1 + $0x190] sm:$0xff]   ;;  %v973_v3 = vld [vmem:[%s1223_s1 + $0x188] sm:$0xff]   ;;  %v975_v5 = vld [vmem:[%s1223_s1 + $0x1c0] sm:$0xff]  }
  0x17   :  { %v976_v6 = vld [vmem:[%s1223_s1 + $0x100] sm:$0xff]   ;;  %v17_v8 = vld [vmem:[%s1224_s0 + $0x10] sm:$0xff]  ;;  %v18_v12 = vld [vmem:[%s1224_s0 + $0x18] sm:$0xff] }
  0x18   :  { %837 = vmatpush3.bf16.msra.mxu0 %v936_v22  ;;  %v977_v7 = vld [vmem:[%s1223_s1 + $0x180] sm:$0xff]   ;;  %v21_v9 = vld [vmem:[%s1224_s0 + $0x30] sm:$0xff]  ;;  %v22_v13 = vld [vmem:[%s1224_s0 + $0x38] sm:$0xff] }
  0x19   :  { %859 = vmatpush3.bf16.msra.mxu1 %v937_v23  ;;  %838 = vmatprep.subr.bf16.mxu0 %v938_v24  ;;  %v758_v10 = vcombine.low %v17_v8, %v21_v9  ;;  %v759_v11 = vcombine.high %v17_v8, %v21_v9  ;;  %v760_v14 = vcombine.low %v18_v12, %v22_v13  ;;  %v753_v23 = vld [vmem:[%s1225_s2] ss:$0 sm:$0xff] }
  0x1a   :  { %860 = vmatprep.subr.bf16.mxu1 %v939_v25  ;;  %v761_v15 = vcombine.high %v18_v12, %v22_v13 }
  0x1c   :  { %839 = vmatpush3.bf16.msra.mxu0 %v940_v26 }
  0x1d   :  { %861 = vmatpush3.bf16.msra.mxu1 %v941_v27  ;;  %840 = vmatprep.subr.bf16.mxu0 %v942_v28 }
  0x1e   :  { %862 = vmatprep.subr.bf16.mxu1 %v943_v29 }
  0x20   :  { %841 = vmatpush3.bf16.msra.mxu0 %v944_v30 }
  0x21   :  { %863 = vmatpush3.bf16.msra.mxu1 %v945_v31  ;;  %870 = vmatprep.subr.bf16.mxu0 %v946_v40 }
  0x22   :  { %892 = vmatprep.subr.bf16.mxu1 %v947_v41 }
  0x23   :  { %615 = vmatmul.mubr.bf16.vlgmr.msra.gmra.mxu0 %v754_v35 }
  0x24   :  { %656 = vmatmul.mubr.bf16.vlgmr.msra.gmra.mxu1 %v756_v38  ;;  %871 = vmatpush3.bf16.msra.mxu0 %v948_v42 }
  0x25   :  { %893 = vmatpush3.bf16.msra.mxu1 %v949_v43  ;;  %872 = vmatprep.subr.bf16.mxu0 %v950_v44 }
  0x26   :  { %894 = vmatprep.subr.bf16.mxu1 %v951_v45  ;;  %696 = vmatprep.mubr.bf16.mxu0 %v759_v11 }
  0x27   :  { %737 = vmatprep.mubr.bf16.mxu1 %v761_v15 }
  0x28   :  { %873 = vmatpush3.bf16.msra.mxu0 %v952_v46 }
  0x29   :  { %895 = vmatpush3.bf16.msra.mxu1 %v953_v47  ;;  %874 = vmatprep.subr.bf16.mxu0 %v954_v48 }
  0x2a   :  { %896 = vmatprep.subr.bf16.mxu1 %v955_v49 }
  0x2c   :  { %875 = vmatpush3.bf16.msra.mxu0 %v956_v50 }
  0x2d   :  { %897 = vmatpush3.bf16.msra.mxu1 %v957_v51  ;;  %876 = vmatprep.subr.bf16.mxu0 %v958_v52 }
  0x2e   :  { %898 = vmatprep.subr.bf16.mxu1 %v959_v53 }
  0x30   :  { %877 = vmatpush3.bf16.msra.mxu0 %v960_v54 }
  0x31   :  { %899 = vmatpush3.bf16.msra.mxu1 %v961_v55  ;;  %878 = vmatprep.subr.bf16.mxu0 %v962_v56 }
  0x32   :  { %900 = vmatprep.subr.bf16.mxu1 %v963_v57 }
  0x34   :  { %879 = vmatpush3.bf16.msra.mxu0 %v964_v58 }
  0x35   :  { %901 = vmatpush3.bf16.msra.mxu1 %v965_v59  ;;  %880 = vmatprep.subr.bf16.mxu0 %v966_v60 }
  0x36   :  { %902 = vmatprep.subr.bf16.mxu1 %v967_v61 }
  0x38   :  { %881 = vmatpush3.bf16.msra.mxu0 %v968_v62 }
  0x39   :  { %903 = vmatpush3.bf16.msra.mxu1 %v969_v63  ;;  %882 = vmatprep.subr.bf16.mxu0 %v970_v0 }
  0x3a   :  { %904 = vmatprep.subr.bf16.mxu1 %v971_v1 }
  0x3c   :  { %883 = vmatpush3.bf16.msra.mxu0 %v972_v2 }
  0x3d   :  { %905 = vmatpush3.bf16.msra.mxu1 %v973_v3  ;;  %884 = vmatprep.subr.bf16.mxu0 %v974_v4 }
  0x3e   :  { %906 = vmatprep.subr.bf16.mxu1 %v975_v5 }
  0x40   :  { %885 = vmatpush3.bf16.msra.mxu0 %v976_v6 }
  0x41   :  { %907 = vmatpush3.bf16.msra.mxu1 %v977_v7 }
  0x43   :  { %697 = vmatmul.mubr.bf16.vlgmr.msra.gmra.mxu0 %v758_v10 }
  0x44   :  { %738 = vmatmul.mubr.bf16.vlgmr.msra.gmra.mxu1 %v760_v14 }
  0xe3   :  { %v842_v16 = vpop.f32.mrf.mxu0 }
  0xe4   :  { %v864_v17 = vpop.f32.mrf.mxu1 }
  0xe5   :  { %v843_v18 = vpop.f32.mrf.mxu0 }
  0xe6   :  { %v865_v19 = vpop.f32.mrf.mxu1  ;;  %v844_v21 = vadd.f32 %v843_v18, %v842_v16 }
  0xe7   :  { %v845_v20 = vpop.f32.mrf.mxu0  ;;  %v866_v26 = vadd.f32 %v865_v19, %v864_v17 }
  0xe8   :  { %v867_v22 = vpop.f32.mrf.mxu1  ;;  %v617_v25 = vadd.f32 %v844_v21, %v753_v23 }
  0xe9   :  { %v846_v24 = vpop.f32.mrf.mxu0 }
  0xea   :  { %v847_v27 = vadd.f32 %v846_v24, %v845_v20  ;;  %v868_v28 = vpop.f32.mrf.mxu1  ;;  %v658_v32 = vadd.f32 %v866_v26, %v617_v25 }
  0xeb   :  { %v869_v37 = vadd.f32 %v868_v28, %v867_v22 }
  0xec   :  { %v620_v33 = vadd.f32 %v847_v27, %v753_v23 }
  0xee   :  { %v661_v42 = vadd.f32 %v869_v37, %v620_v33 }
 0x103   :  { %v886_v29 = vpop.f32.mrf.mxu0 }
 0x104   :  { %v908_v30 = vpop.f32.mrf.mxu1 }
 0x105   :  { %v887_v31 = vpop.f32.mrf.mxu0 }
 0x106   :  { %v888_v34 = vadd.f32 %v887_v31, %v886_v29  ;;  %v909_v35 = vpop.f32.mrf.mxu1 }
 0x107   :  { %v889_v36 = vpop.f32.mrf.mxu0  ;;  %v910_v39 = vadd.f32 %v909_v35, %v908_v30 }
 0x108   :  { %v699_v38 = vadd.f32 %v888_v34, %v658_v32  ;;  %v911_v40 = vpop.f32.mrf.mxu1 }
 0x109   :  { %v890_v41 = vpop.f32.mrf.mxu0 }
 0x10a   :  { %v740_v43 = vadd.f32 %v910_v39, %v699_v38  ;;  %v891_v44 = vadd.f32 %v890_v41, %v889_v36  ;;  %v912_v45 = vpop.f32.mrf.mxu1 }
 0x10b   :  { %v913_v47 = vadd.f32 %v912_v45, %v911_v40 }
 0x10c   :  { %747 = vst.msk [vmem:[%s1226_s3] sm:$0xff] %vm746_vm0, %v740_v43  ;;  %v702_v46 = vadd.f32 %v891_v44, %v661_v42 }
 0x10e   :  { %v743_v48 = vadd.f32 %v913_v47, %v702_v46 }
 0x110   :  { %748 = vst.msk [vmem:[%s1226_s3 + $0x8] sm:$0xff] %vm746_vm0, %v743_v48 }

</bundles_post_ra>
